<compile_context>
chip_gen: v5e
topology: v5e:2x2
jax: 0.10.0
libtpu: 0.0.40
codegen_flags: <defaults>
</compile_context>

<pallas_src>
import math
import functools

import jax
import jax.numpy as jnp
from jax.experimental import pallas as pl
from jax.experimental.pallas import tpu as pltpu


# --------------------------------------------------------------------------- kernels


def _attn_ffn_core(q, kv, x_res, w1_ref, w2_ref, b1_ref, vecs_ref, out_ref,
                   *, num_heads, head_size, eps, compute_dtype):
    """Shared attention + residual/LN1 + FFN + residual/LN2 given projected q and kv.

    q:  (TQ, H)  f32, already scaled by 1/sqrt(head_size) (folded into Wq/bq)
    kv: (S, 2H)  compute_dtype or f32, [K | V] with biases already added
    """
    H = num_heads * head_size
    cd = compute_dtype
    TQ = q.shape[0]
    S = kv.shape[0]

    # ---- attention: lane-dense, no per-head masked stores ----------------------
    if num_heads == 1:
        k = kv[:, :H].astype(cd)
        v = kv[:, H:].astype(cd)
        # trans-B matmul: contract the last axis of both operands (no k.T / XLU).
        s = jax.lax.dot_general(q.astype(cd), k,
                                dimension_numbers=(((1,), (1,)), ((), ())),
                                preferred_element_type=jnp.float32)          # (TQ, S)
        s = s - jnp.max(s, axis=-1, keepdims=True)
        p = jnp.exp(s)
        p = p * pl.reciprocal(jnp.sum(p, axis=-1, keepdims=True), approx=True)
        ctx = jnp.dot(p.astype(cd), v, preferred_element_type=jnp.float32)   # (TQ, H)
    else:
        # Batched over heads: a single einsum pair instead of a num_heads-way unroll
        # of small matmuls + sub-lane-width scratch writes.
        qh = q.reshape(TQ, num_heads, head_size).transpose(1, 0, 2).astype(cd)
        kh = kv[:, :H].reshape(S, num_heads, head_size).transpose(1, 0, 2).astype(cd)
        vh = kv[:, H:].reshape(S, num_heads, head_size).transpose(1, 0, 2).astype(cd)
        s = jnp.einsum("hqd,hkd->hqk", qh, kh,
                       preferred_element_type=jnp.float32)                   # (nh, TQ, S)
        s = s - jnp.max(s, axis=-1, keepdims=True)
        p = jnp.exp(s)
        p = p * pl.reciprocal(jnp.sum(p, axis=-1, keepdims=True), approx=True)
        ctx = jnp.einsum("hqk,hkd->hqd", p.astype(cd), vh,
                         preferred_element_type=jnp.float32)                 # (nh, TQ, hd)
        ctx = ctx.transpose(1, 0, 2).reshape(TQ, H)      # one lane-dense (TQ, H) value

    # ---- residual + LayerNorm 1 (f32) -------------------------------------------
    y = x_res.astype(jnp.float32) + ctx
    mu = jnp.mean(y, axis=-1, keepdims=True)
    yc = y - mu
    var = jnp.mean(yc * yc, axis=-1, keepdims=True)
    g1 = vecs_ref[1:2]
    be1 = vecs_ref[2:3]
    y = yc * jax.lax.rsqrt(var + eps) * g1 + be1

    # ---- feed-forward: Linear -> ReLU -> Linear ----------------------------------
    h1 = jnp.dot(y.astype(cd), w1_ref[...],
                 preferred_element_type=jnp.float32) + b1_ref[...]
    h1 = jnp.maximum(h1, 0.0)
    ff = jnp.dot(h1.astype(cd), w2_ref[...],
                 preferred_element_type=jnp.float32) + vecs_ref[0:1]

    # ---- residual + LayerNorm 2 (f32) --------------------------------------------
    z = y + ff
    mu2 = jnp.mean(z, axis=-1, keepdims=True)
    zc = z - mu2
    var2 = jnp.mean(zc * zc, axis=-1, keepdims=True)
    g2 = vecs_ref[3:4]
    be2 = vecs_ref[4:5]
    out_ref[0] = (zc * jax.lax.rsqrt(var2 + eps) * g2 + be2).astype(out_ref.dtype)


def _single_tile_kernel(x_ref, wqkv_ref, w1_ref, w2_ref, bqkv_ref, b1_ref, vecs_ref,
                        out_ref, *, num_heads, head_size, eps, compute_dtype):
    """Whole sequence in one tile: Q|K|V projection fused into one (H, 3H) MXU pass."""
    H = num_heads * head_size
    cd = compute_dtype
    x = x_ref[0]                                                      # (S, H)
    qkv = jnp.dot(x.astype(cd), wqkv_ref[...],
                  preferred_element_type=jnp.float32) + bqkv_ref[...]  # (S, 3H) f32
    q = qkv[:, :H]
    kv = qkv[:, H:]
    _attn_ffn_core(q, kv, x, w1_ref, w2_ref, b1_ref, vecs_ref, out_ref,
                   num_heads=num_heads, head_size=head_size, eps=eps,
                   compute_dtype=cd)


def _tiled_kernel(xq_ref, xkv_ref, wq_ref, wkv_ref, w1_ref, w2_ref, bqkv_ref, b1_ref,
                  vecs_ref, out_ref, kv_scr, *, num_heads, head_size, eps,
                  compute_dtype):
    """Query rows tiled over t; K/V projection computed once per batch into kv_scr.

    Requires the t grid axis to be 'arbitrary' (scratch is carried across t steps).
    """
    H = num_heads * head_size
    cd = compute_dtype

    @pl.when(pl.program_id(1) == 0)
    def _():
        bkv = bqkv_ref[0:1, H:3 * H]
        kv = jnp.dot(xkv_ref[0].astype(cd), wkv_ref[...],
                     preferred_element_type=jnp.float32) + bkv          # (S, 2H) f32
        kv_scr[...] = kv.astype(kv_scr.dtype)

    xq = xq_ref[0]                                                      # (TQ, H)
    bq = bqkv_ref[0:1, 0:H]
    q = jnp.dot(xq.astype(cd), wq_ref[...],
                preferred_element_type=jnp.float32) + bq                # (TQ, H) f32
    _attn_ffn_core(q, kv_scr[...], xq, w1_ref, w2_ref, b1_ref, vecs_ref, out_ref,
                   num_heads=num_heads, head_size=head_size, eps=eps,
                   compute_dtype=cd)


# --------------------------------------------------------------------------- wrapper


def _vmem_capacity_bytes():
    """Physical VMEM per TensorCore; falls back to the most conservative (v7x) size."""
    try:
        info = pltpu.get_tpu_info()
        cap = getattr(info, "vmem_capacity_bytes", None)
        if cap:
            return int(cap)
    except Exception:
        pass
    return 64 * 1024 * 1024


def _choose_q_tile(S, target):
    """Largest tile <= target that divides S and keeps the sublane rule (mult of 8)."""
    if S <= target:
        return S
    cand = (min(target, S) // 8) * 8
    while cand >= 8:
        if S % cand == 0:
            return cand
        cand -= 8
    return S  # fall back: whole sequence in one tile


def transformer_layer(src, params, *, num_heads, eps=1e-5, q_tile=None,
                      compute_dtype=jnp.bfloat16):
    """src: [B, S, H] float32. params follow torch Linear/LayerNorm conventions."""
    B, S, H = src.shape
    assert H % num_heads == 0
    head_size = H // num_heads
    F = params["w1"].shape[0]
    cd = compute_dtype

    # ---- generation-aware VMEM budget & q tile ----------------------------------
    vmem_cap = _vmem_capacity_bytes()
    vmem_limit = min(int(vmem_cap * 0.75), 112 * 1024 * 1024)  # ~48 MiB v7x, ~96 MiB v5e/v6e
    if q_tile is None:
        q_tile = 512 if vmem_cap >= (96 << 20) else 256
    TQ = _choose_q_tile(S, q_tile)
    n_t = S // TQ

    # ---- parameter prep (wrapper glue, not the hot path) -------------------------
    # torch Linear weights are (out,in): transpose to (in,out); fold 1/sqrt(hd) into
    # Wq/bq; pack small bias / LayerNorm vectors into 3 arrays (fewer DMA descriptors).
    scale = 1.0 / math.sqrt(head_size)
    wq_t = params["wq"].T * scale
    bq = params["bq"] * scale
    wk_t = params["wk"].T
    wv_t = params["wv"].T
    w1 = params["w1"].T.astype(cd)                                          # (H, F)
    w2 = params["w2"].T.astype(cd)                                          # (F, H)
    bqkv = jnp.concatenate([bq, params["bk"], params["bv"]]
                           ).reshape(1, 3 * H).astype(jnp.float32)          # (1, 3H)
    b1 = params["b1"].reshape(1, F).astype(jnp.float32)                     # (1, F)
    vecs = jnp.stack([params["b2"], params["g1"], params["beta1"],
                      params["g2"], params["beta2"]], axis=0).astype(jnp.float32)  # (5, H)

    # ---- advisory cost estimate for the XLA scheduler ----------------------------
    itemsize = jnp.dtype(cd).itemsize
    flops = int(2 * B * S * H * 3 * H                       # QKV projections
                + 4 * B * num_heads * S * S * head_size     # scores + PV
                + 4 * B * S * H * F)                        # FFN
    transcendentals = int(B * num_heads * S * S)            # softmax exp
    bytes_accessed = int(2 * src.size * src.dtype.itemsize
                         + (3 * H * H + 2 * H * F) * itemsize
                         + (3 * H + F + 5 * H) * 4)
    cost = pl.CostEstimate(flops=flops, transcendentals=transcendentals,
                           bytes_accessed=bytes_accessed)

    if n_t == 1:
        # Whole sequence fits in one q-tile: fuse Q into the K|V projection — one
        # (H, 3H) MXU pass — and skip the kv scratch entirely.
        wqkv = jnp.concatenate([wq_t, wk_t, wv_t], axis=1).astype(cd)       # (H, 3H)
        kernel = functools.partial(_single_tile_kernel, num_heads=num_heads,
                                   head_size=head_size, eps=eps, compute_dtype=cd)
        grid = (B,)
        const = lambda shape: pl.BlockSpec(shape, lambda b: tuple(0 for _ in shape))
        in_specs = [
            pl.BlockSpec((1, S, H), lambda b: (b, 0, 0)),
            const((H, 3 * H)), const((H, F)), const((F, H)),
            const((1, 3 * H)), const((1, F)), const((5, H)),
        ]
        out_specs = pl.BlockSpec((1, S, H), lambda b: (b, 0, 0))
        scratch = []
        inputs = (src, wqkv, w1, w2, bqkv, b1, vecs)
        dims = ("parallel",)
    else:
        # Query rows tiled; K/V projection computed once per batch into a persistent
        # VMEM scratch (compute_dtype), so it is NOT redone for every query tile.
        # The t axis must be 'arbitrary' because the scratch is carried across t.
        # (On v7x with B == 1 this forgoes 2-TC sharding over t; shard B there.)
        wq = wq_t.astype(cd)                                                # (H, H)
        wkv = jnp.concatenate([wk_t, wv_t], axis=1).astype(cd)              # (H, 2H)
        kernel = functools.partial(_tiled_kernel, num_heads=num_heads,
                                   head_size=head_size, eps=eps, compute_dtype=cd)
        grid = (B, n_t)
        const = lambda shape: pl.BlockSpec(shape, lambda b, t: tuple(0 for _ in shape))
        in_specs = [
            pl.BlockSpec((1, TQ, H), lambda b, t: (b, t, 0)),   # query-row tile
            pl.BlockSpec((1, S, H), lambda b, t: (b, 0, 0)),    # full context (t == 0)
            const((H, H)), const((H, 2 * H)), const((H, F)), const((F, H)),
            const((1, 3 * H)), const((1, F)), const((5, H)),
        ]
        out_specs = pl.BlockSpec((1, TQ, H), lambda b, t: (b, t, 0))
        scratch = [pltpu.VMEM((S, 2 * H), cd)]                  # per-batch K|V cache
        inputs = (src, src, wq, wkv, w1, w2, bqkv, b1, vecs)
        dims = ("parallel", "arbitrary")

    return pl.pallas_call(
        kernel,
        out_shape=jax.ShapeDtypeStruct((B, S, H), src.dtype),
        grid_spec=pltpu.PrefetchScalarGridSpec(
            num_scalar_prefetch=0,
            grid=grid,
            in_specs=in_specs,
            out_specs=out_specs,
            scratch_shapes=scratch,
        ),
        compiler_params=pltpu.CompilerParams(
            dimension_semantics=dims,
            vmem_limit_bytes=vmem_limit,
        ),
        cost_estimate=cost,
    )(*inputs)


# --------------------------------------------------------------------------- reference


def _reference(src, params, *, num_heads, eps=1e-5):
    """Pure-JAX reference mirroring the PyTorch module (eval mode)."""
    B, S, H = src.shape
    hd = H // num_heads

    def lin(x, w, b):
        return x @ w.T + b

    q = lin(src, params["wq"], params["bq"]).reshape(B, S, num_heads, hd).transpose(0, 2, 1, 3)
    k = lin(src, params["wk"], params["bk"]).reshape(B, S, num_heads, hd).transpose(0, 2, 1, 3)
    v = lin(src, params["wv"], params["bv"]).reshape(B, S, num_heads, hd).transpose(0, 2, 1, 3)
    scores = jnp.einsum("bnqd,bnkd->bnqk", q, k) / math.sqrt(hd)
    probs = jax.nn.softmax(scores, axis=-1)
    ctx = jnp.einsum("bnqk,bnkd->bnqd", probs, v).transpose(0, 2, 1, 3).reshape(B, S, H)

    def ln(x, g, b):
        mu = x.mean(-1, keepdims=True)
        var = ((x - mu) ** 2).mean(-1, keepdims=True)
        return (x - mu) * jax.lax.rsqrt(var + eps) * g + b

    y = ln(src + ctx, params["g1"], params["beta1"])
    ff = lin(jnp.maximum(lin(y, params["w1"], params["b1"]), 0.0), params["w2"], params["b2"])
    return ln(y + ff, params["g2"], params["beta2"])


def _init_params(key, hidden, dim_ff):
    """Deterministic torch-nn.Linear-style uniform init."""
    ks = jax.random.split(key, 10)

    def linear(kw, kb, fan_in, fan_out):
        bound = 1.0 / math.sqrt(fan_in)
        w = jax.random.uniform(kw, (fan_out, fan_in), jnp.float32, -bound, bound)
        b = jax.random.uniform(kb, (fan_out,), jnp.float32, -bound, bound)
        return w, b

    wq, bq = linear(ks[0], ks[1], hidden, hidden)
    wk, bk = linear(ks[2], ks[3], hidden, hidden)
    wv, bv = linear(ks[4], ks[5], hidden, hidden)
    w1, b1 = linear(ks[6], ks[7], hidden, dim_ff)
    w2, b2 = linear(ks[8], ks[9], dim_ff, hidden)
    return dict(
        wq=wq, bq=bq, wk=wk, bk=bk, wv=wv, bv=bv,
        w1=w1, b1=b1, w2=w2, b2=b2,
        g1=jnp.ones((hidden,), jnp.float32), beta1=jnp.zeros((hidden,), jnp.float32),
        g2=jnp.ones((hidden,), jnp.float32), beta2=jnp.zeros((hidden,), jnp.float32),
    )


if __name__ == "__main__":
    key = jax.random.PRNGKey(0)
    k_x, k_p, k_x2, k_p2 = jax.random.split(key, 4)

    # ---- config A: module defaults (nhead=1, dim_feedforward=128), single q-tile --
    B, S, H, NHEAD, DIM_FF = 2, 8, 32, 1, 128
    src = jax.random.normal(k_x, (B, S, H), jnp.float32)
    params = _init_params(k_p, H, DIM_FF)
    ref = _reference(src, params, num_heads=NHEAD)

    # f32 compute path (strict tolerance; covers the EUP approximate reciprocal).
    out_f32 = jax.block_until_ready(
        transformer_layer(src, params, num_heads=NHEAD, compute_dtype=jnp.float32))
    assert out_f32.shape == (B, S, H)
    assert jnp.allclose(out_f32, ref, atol=1e-2, rtol=1e-2), "f32 kernel mismatch vs reference"

    # default bf16 MXU operands with f32 accumulation (v5e/v6e fast path).
    out_bf16 = jax.block_until_ready(transformer_layer(src, params, num_heads=NHEAD))
    assert jnp.allclose(out_bf16, ref, atol=5e-2, rtol=5e-2), "bf16 kernel mismatch vs reference"

    # ---- config B: longer sequence, q_tile=8 -> grid (B, 4): exercises the tiled
    # path with the per-batch K|V cache in VMEM scratch and the 'arbitrary' t axis.
    B2, S2 = 2, 32
    src2 = jax.random.normal(k_x2, (B2, S2, H), jnp.float32)
    params2 = _init_params(k_p2, H, DIM_FF)
    ref2 = _reference(src2, params2, num_heads=NHEAD)

    out2_f32 = jax.block_until_ready(
        transformer_layer(src2, params2, num_heads=NHEAD, q_tile=8,
                          compute_dtype=jnp.float32))
    assert out2_f32.shape == (B2, S2, H)
    assert jnp.allclose(out2_f32, ref2, atol=1e-2, rtol=1e-2), "tiled f32 kernel mismatch"

    out2_bf16 = jax.block_until_ready(
        transformer_layer(src2, params2, num_heads=NHEAD, q_tile=8))
    assert jnp.allclose(out2_bf16, ref2, atol=5e-2, rtol=5e-2), "tiled bf16 kernel mismatch"

    # TODO(synk): attention_mask=None path only; dropout is inference-mode identity.
    print("KERNEL_OK")
</pallas_src>

<mosaic_0001>
module attributes {stable_mosaic.version = 11 : i64} {
  func.func @_single_tile_kernel(%arg0: i32, %arg1: memref<1x8x32xf32, #tpu.memory_space<vmem>>, %arg2: memref<32x96xf32, #tpu.memory_space<vmem>>, %arg3: memref<32x128xf32, #tpu.memory_space<vmem>>, %arg4: memref<128x32xf32, #tpu.memory_space<vmem>>, %arg5: memref<1x96xf32, #tpu.memory_space<vmem>>, %arg6: memref<1x128xf32, #tpu.memory_space<vmem>>, %arg7: memref<5x32xf32, #tpu.memory_space<vmem>>, %arg8: memref<1x8x32xf32, #tpu.memory_space<vmem>>) attributes {dimension_semantics = [#tpu.dimension_semantics<parallel>], iteration_bounds = array<i64: 2>, scalar_prefetch = 0 : i64, scratch_operands = 0 : i64, tpu.core_type = #tpu.core_type<tc>, window_params = [{transform_indices = @transform_0, window_bounds = array<i64: 1, 8, 32>}, {pipeline_mode = #tpu.pipeline_mode<synchronous>, transform_indices = @transform_1, window_bounds = array<i64: 32, 96>}, {pipeline_mode = #tpu.pipeline_mode<synchronous>, transform_indices = @transform_2, window_bounds = array<i64: 32, 128>}, {pipeline_mode = #tpu.pipeline_mode<synchronous>, transform_indices = @transform_3, window_bounds = array<i64: 128, 32>}, {pipeline_mode = #tpu.pipeline_mode<synchronous>, transform_indices = @transform_4, window_bounds = array<i64: 1, 96>}, {pipeline_mode = #tpu.pipeline_mode<synchronous>, transform_indices = @transform_5, window_bounds = array<i64: 1, 128>}, {pipeline_mode = #tpu.pipeline_mode<synchronous>, transform_indices = @transform_6, window_bounds = array<i64: 5, 32>}, {transform_indices = @transform_7, window_bounds = array<i64: 1, 8, 32>}]} {
    %c0 = arith.constant 0 : index
    %c0_0 = arith.constant 0 : index
    %c0_1 = arith.constant 0 : index
    %0 = vector.load %arg1[%c0, %c0_0, %c0_1] : memref<1x8x32xf32, #tpu.memory_space<vmem>>, vector<1x8x32xf32>
    %1 = vector.shape_cast %0 : vector<1x8x32xf32> to vector<8x32xf32>
    %c0_2 = arith.constant 0 : index
    %c0_3 = arith.constant 0 : index
    %2 = vector.load %arg2[%c0_2, %c0_3] : memref<32x96xf32, #tpu.memory_space<vmem>>, vector<32x96xf32>
    %cst = arith.constant dense<0.000000e+00> : vector<8x96xf32>
    %3 = tpu.matmul %1, %2, %cst {dimension_numbers = #tpu.dot_dimension_numbers<[1], [0], [0], [1], [0, 0, 1, 1], [], []>} : vector<8x32xf32>, vector<32x96xf32>, vector<8x96xf32> -> vector<8x96xf32>
    %c0_4 = arith.constant 0 : index
    %c0_5 = arith.constant 0 : index
    %4 = vector.load %arg5[%c0_4, %c0_5] : memref<1x96xf32, #tpu.memory_space<vmem>>, vector<1x96xf32>
    %5 = vector.broadcast %4 : vector<1x96xf32> to vector<8x96xf32>
    %6 = arith.addf %3, %5 : vector<8x96xf32>
    %7 = vector.extract_strided_slice %6 {offsets = [0, 0], sizes = [8, 32], strides = [1, 1]} : vector<8x96xf32> to vector<8x32xf32>
    %8 = vector.extract_strided_slice %6 {offsets = [0, 32], sizes = [8, 64], strides = [1, 1]} : vector<8x96xf32> to vector<8x64xf32>
    %9 = vector.extract_strided_slice %8 {offsets = [0, 0], sizes = [8, 32], strides = [1, 1]} : vector<8x64xf32> to vector<8x32xf32>
    %10 = vector.extract_strided_slice %8 {offsets = [0, 32], sizes = [8, 32], strides = [1, 1]} : vector<8x64xf32> to vector<8x32xf32>
    %cst_6 = arith.constant dense<0.000000e+00> : vector<8x8xf32>
    %11 = tpu.matmul %7, %9, %cst_6 {dimension_numbers = #tpu.dot_dimension_numbers<[1], [1], [0], [0], [0, 0, 1, 0], [], []>} : vector<8x32xf32>, vector<8x32xf32>, vector<8x8xf32> -> vector<8x8xf32>
    %cst_7 = arith.constant dense<0xFF800000> : vector<8xf32>
    %12 = vector.multi_reduction <maximumf>, %11, %cst_7 [1] : vector<8x8xf32> to vector<8xf32>
    %13 = vector.shape_cast %12 : vector<8xf32> to vector<8x1xf32>
    %14 = vector.broadcast %13 : vector<8x1xf32> to vector<8x8xf32>
    %15 = arith.subf %11, %14 : vector<8x8xf32>
    %16 = math.exp %15 : vector<8x8xf32>
    %cst_8 = arith.constant dense<0.000000e+00> : vector<8xf32>
    %17 = vector.multi_reduction <add>, %16, %cst_8 [1] : vector<8x8xf32> to vector<8xf32>
    %18 = vector.shape_cast %17 : vector<8xf32> to vector<8x1xf32>
    %19 = tpu.reciprocal %18 {approx = true} : vector<8x1xf32> -> vector<8x1xf32>
    %20 = vector.broadcast %19 : vector<8x1xf32> to vector<8x8xf32>
    %21 = arith.mulf %16, %20 : vector<8x8xf32>
    %cst_9 = arith.constant dense<0.000000e+00> : vector<8x32xf32>
    %22 = tpu.matmul %21, %10, %cst_9 {dimension_numbers = #tpu.dot_dimension_numbers<[1], [0], [0], [1], [0, 0, 1, 1], [], []>} : vector<8x8xf32>, vector<8x32xf32>, vector<8x32xf32> -> vector<8x32xf32>
    %23 = arith.addf %1, %22 : vector<8x32xf32>
    %cst_10 = arith.constant dense<0.000000e+00> : vector<8xf32>
    %24 = vector.multi_reduction <add>, %23, %cst_10 [1] : vector<8x32xf32> to vector<8xf32>
    %25 = vector.shape_cast %24 : vector<8xf32> to vector<8x1xf32>
    %cst_11 = arith.constant 3.200000e+01 : f32
    %26 = vector.broadcast %cst_11 : f32 to vector<8x1xf32>
    %27 = arith.divf %25, %26 : vector<8x1xf32>
    %28 = vector.broadcast %27 : vector<8x1xf32> to vector<8x32xf32>
    %29 = arith.subf %23, %28 : vector<8x32xf32>
    %30 = arith.mulf %29, %29 : vector<8x32xf32>
    %cst_12 = arith.constant dense<0.000000e+00> : vector<8xf32>
    %31 = vector.multi_reduction <add>, %30, %cst_12 [1] : vector<8x32xf32> to vector<8xf32>
    %32 = vector.shape_cast %31 : vector<8xf32> to vector<8x1xf32>
    %cst_13 = arith.constant 3.200000e+01 : f32
    %33 = vector.broadcast %cst_13 : f32 to vector<8x1xf32>
    %34 = arith.divf %32, %33 : vector<8x1xf32>
    %c1 = arith.constant 1 : index
    %c0_14 = arith.constant 0 : index
    %35 = vector.load %arg7[%c1, %c0_14] : memref<5x32xf32, #tpu.memory_space<vmem>>, vector<1x32xf32>
    %c2 = arith.constant 2 : index
    %c0_15 = arith.constant 0 : index
    %36 = vector.load %arg7[%c2, %c0_15] : memref<5x32xf32, #tpu.memory_space<vmem>>, vector<1x32xf32>
    %cst_16 = arith.constant 9.99999974E-6 : f32
    %37 = vector.broadcast %cst_16 : f32 to vector<8x1xf32>
    %38 = arith.addf %34, %37 : vector<8x1xf32>
    %39 = math.rsqrt %38 : vector<8x1xf32>
    %40 = vector.broadcast %39 : vector<8x1xf32> to vector<8x32xf32>
    %41 = arith.mulf %29, %40 : vector<8x32xf32>
    %42 = vector.broadcast %35 : vector<1x32xf32> to vector<8x32xf32>
    %43 = arith.mulf %41, %42 : vector<8x32xf32>
    %44 = vector.broadcast %36 : vector<1x32xf32> to vector<8x32xf32>
    %45 = arith.addf %43, %44 : vector<8x32xf32>
    %c0_17 = arith.constant 0 : index
    %c0_18 = arith.constant 0 : index
    %46 = vector.load %arg3[%c0_17, %c0_18] : memref<32x128xf32, #tpu.memory_space<vmem>>, vector<32x128xf32>
    %cst_19 = arith.constant dense<0.000000e+00> : vector<8x128xf32>
    %47 = tpu.matmul %45, %46, %cst_19 {dimension_numbers = #tpu.dot_dimension_numbers<[1], [0], [0], [1], [0, 0, 1, 1], [], []>} : vector<8x32xf32>, vector<32x128xf32>, vector<8x128xf32> -> vector<8x128xf32>
    %c0_20 = arith.constant 0 : index
    %c0_21 = arith.constant 0 : index
    %48 = vector.load %arg6[%c0_20, %c0_21] : memref<1x128xf32, #tpu.memory_space<vmem>>, vector<1x128xf32>
    %49 = vector.broadcast %48 : vector<1x128xf32> to vector<8x128xf32>
    %50 = arith.addf %47, %49 : vector<8x128xf32>
    %cst_22 = arith.constant 0.000000e+00 : f32
    %51 = vector.broadcast %cst_22 : f32 to vector<8x128xf32>
    %52 = arith.maximumf %50, %51 : vector<8x128xf32>
    %c0_23 = arith.constant 0 : index
    %c0_24 = arith.constant 0 : index
    %53 = vector.load %arg4[%c0_23, %c0_24] : memref<128x32xf32, #tpu.memory_space<vmem>>, vector<128x32xf32>
    %cst_25 = arith.constant dense<0.000000e+00> : vector<8x32xf32>
    %54 = tpu.matmul %52, %53, %cst_25 {dimension_numbers = #tpu.dot_dimension_numbers<[1], [0], [0], [1], [0, 0, 1, 1], [], []>} : vector<8x128xf32>, vector<128x32xf32>, vector<8x32xf32> -> vector<8x32xf32>
    %c0_26 = arith.constant 0 : index
    %c0_27 = arith.constant 0 : index
    %55 = vector.load %arg7[%c0_26, %c0_27] : memref<5x32xf32, #tpu.memory_space<vmem>>, vector<1x32xf32>
    %56 = vector.broadcast %55 : vector<1x32xf32> to vector<8x32xf32>
    %57 = arith.addf %54, %56 : vector<8x32xf32>
    %58 = arith.addf %45, %57 : vector<8x32xf32>
    %cst_28 = arith.constant dense<0.000000e+00> : vector<8xf32>
    %59 = vector.multi_reduction <add>, %58, %cst_28 [1] : vector<8x32xf32> to vector<8xf32>
    %60 = vector.shape_cast %59 : vector<8xf32> to vector<8x1xf32>
    %cst_29 = arith.constant 3.200000e+01 : f32
    %61 = vector.broadcast %cst_29 : f32 to vector<8x1xf32>
    %62 = arith.divf %60, %61 : vector<8x1xf32>
    %63 = vector.broadcast %62 : vector<8x1xf32> to vector<8x32xf32>
    %64 = arith.subf %58, %63 : vector<8x32xf32>
    %65 = arith.mulf %64, %64 : vector<8x32xf32>
    %cst_30 = arith.constant dense<0.000000e+00> : vector<8xf32>
    %66 = vector.multi_reduction <add>, %65, %cst_30 [1] : vector<8x32xf32> to vector<8xf32>
    %67 = vector.shape_cast %66 : vector<8xf32> to vector<8x1xf32>
    %cst_31 = arith.constant 3.200000e+01 : f32
    %68 = vector.broadcast %cst_31 : f32 to vector<8x1xf32>
    %69 = arith.divf %67, %68 : vector<8x1xf32>
    %c3 = arith.constant 3 : index
    %c0_32 = arith.constant 0 : index
    %70 = vector.load %arg7[%c3, %c0_32] : memref<5x32xf32, #tpu.memory_space<vmem>>, vector<1x32xf32>
    %c4 = arith.constant 4 : index
    %c0_33 = arith.constant 0 : index
    %71 = vector.load %arg7[%c4, %c0_33] : memref<5x32xf32, #tpu.memory_space<vmem>>, vector<1x32xf32>
    %cst_34 = arith.constant 9.99999974E-6 : f32
    %72 = vector.broadcast %cst_34 : f32 to vector<8x1xf32>
    %73 = arith.addf %69, %72 : vector<8x1xf32>
    %74 = math.rsqrt %73 : vector<8x1xf32>
    %75 = vector.broadcast %74 : vector<8x1xf32> to vector<8x32xf32>
    %76 = arith.mulf %64, %75 : vector<8x32xf32>
    %77 = vector.broadcast %70 : vector<1x32xf32> to vector<8x32xf32>
    %78 = arith.mulf %76, %77 : vector<8x32xf32>
    %79 = vector.broadcast %71 : vector<1x32xf32> to vector<8x32xf32>
    %80 = arith.addf %78, %79 : vector<8x32xf32>
    %c0_35 = arith.constant 0 : index
    %c0_36 = arith.constant 0 : index
    %c0_37 = arith.constant 0 : index
    %81 = vector.load %arg8[%c0_35, %c0_36, %c0_37] : memref<1x8x32xf32, #tpu.memory_space<vmem>>, vector<1x8x32xf32>
    %82 = vector.shape_cast %81 : vector<1x8x32xf32> to vector<8x32xf32>
    %83 = vector.shape_cast %80 : vector<8x32xf32> to vector<1x8x32xf32>
    tpu.vector_store %arg8[%c0_35, %c0_36, %c0_37], %83 {strides = array<i32>} : memref<1x8x32xf32, #tpu.memory_space<vmem>>, vector<1x8x32xf32>,
    return
  }
  func.func @transform_0(%arg0: i32) -> (i32, i32, i32) {
    %c0_i32 = arith.constant 0 : i32
    %c0_i32_0 = arith.constant 0 : i32
    %c0_i32_1 = arith.constant 0 : i32
    return %arg0, %c0_i32, %c0_i32_0 : i32, i32, i32
  }
  func.func @transform_1(%arg0: i32) -> (i32, i32) {
    %c0_i32 = arith.constant 0 : i32
    %c0_i32_0 = arith.constant 0 : i32
    %c0_i32_1 = arith.constant 0 : i32
    return %c0_i32, %c0_i32_0 : i32, i32
  }
  func.func @transform_2(%arg0: i32) -> (i32, i32) {
    %c0_i32 = arith.constant 0 : i32
    %c0_i32_0 = arith.constant 0 : i32
    %c0_i32_1 = arith.constant 0 : i32
    return %c0_i32, %c0_i32_0 : i32, i32
  }
  func.func @transform_3(%arg0: i32) -> (i32, i32) {
    %c0_i32 = arith.constant 0 : i32
    %c0_i32_0 = arith.constant 0 : i32
    %c0_i32_1 = arith.constant 0 : i32
    return %c0_i32, %c0_i32_0 : i32, i32
  }
  func.func @transform_4(%arg0: i32) -> (i32, i32) {
    %c0_i32 = arith.constant 0 : i32
    %c0_i32_0 = arith.constant 0 : i32
    %c0_i32_1 = arith.constant 0 : i32
    return %c0_i32, %c0_i32_0 : i32, i32
  }
  func.func @transform_5(%arg0: i32) -> (i32, i32) {
    %c0_i32 = arith.constant 0 : i32
    %c0_i32_0 = arith.constant 0 : i32
    %c0_i32_1 = arith.constant 0 : i32
    return %c0_i32, %c0_i32_0 : i32, i32
  }
  func.func @transform_6(%arg0: i32) -> (i32, i32) {
    %c0_i32 = arith.constant 0 : i32
    %c0_i32_0 = arith.constant 0 : i32
    %c0_i32_1 = arith.constant 0 : i32
    return %c0_i32, %c0_i32_0 : i32, i32
  }
  func.func @transform_7(%arg0: i32) -> (i32, i32, i32) {
    %c0_i32 = arith.constant 0 : i32
    %c0_i32_0 = arith.constant 0 : i32
    %c0_i32_1 = arith.constant 0 : i32
    return %arg0, %c0_i32, %c0_i32_0 : i32, i32, i32
  }
}

</mosaic_0001>

<bundles_post_ra>
// kernel: tpu_custom_call.1
= control target key start
LH: loop header
LB: loop body
LE: loop exit
PB: predicated region body
PF: predicated region fallthrough
CT: control target
= control target key end

     0   :  { %12 = vsyncpa [#allocation3], 0  ;;  %s960_s0 = inlined_call_operand.vmem [shape: f32[2,8,32], index: 0, kind: input, shape index: {}]   ;;  %s961_s1 = inlined_call_operand.vmem [shape: f32[32,96], index: 1, kind: input, shape index: {}]   ;;  %s962_s2 = inlined_call_operand.vmem [shape: f32[32,128], index: 2, kind: input, shape index: {}]   ;;  %s963_s3 = inlined_call_operand.vmem [shape: f32[128,32], index: 3, kind: input, shape index: {}]   ;;  %s964_s4 = inlined_call_operand.vmem [shape: f32[1,96], index: 4, kind: input, shape index: {}]   ;;  %s965_s5 = inlined_call_operand.vmem [shape: f32[1,128], index: 5, kind: input, shape index: {}]   ;;  %s966_s6 = inlined_call_operand.vmem [shape: f32[5,32], index: 6, kind: input, shape index: {}]   ;;  %s967_s7 = inlined_call_operand.hbm [shape: f32[2,8,32], index: 7, kind: output, shape index: {}]  }
   0x1   :  { %14 = vsyncpa [#allocation3 + $0x1], 0  ;;  %s764_s24 = smov 0   ;;  %s766_s25 = smov 0  }
   0x2   :  { %s768_s26 = smov 0   ;;  %s770_s27 = smov 0  }
   0x3 LB: > { %s785_s28 = sadd.s32 4294967295, %s719_s27   ;;  %s583_s29 = sadd.s32 4294967294, %s719_s27   ;;  %s719_s27 = sphi %s770_s27, %s973_s27   ;;  %s715_s26 = sphi %s768_s26, %s972_s26   ;;  %s711_s25 = sphi %s766_s25, %s971_s25   ;;  %s707_s24 = sphi %s764_s24, %s970_s24  }
   0x4   : > { %s789_s30 = sadd.s32 1, %s719_s27   ;;  %s179_s8 = sadd.s32 1, %s715_s26 }
   0x5   : > { %s176_s9 = ssub.s32 %s719_s27, %s789_s30  ;;  %p189_p0 = scmp.ne.s32.totalorder %s715_s26, %s711_s25 }
   0x6   : > { %p177_p1 = scmp.eq.s32.totalorder %s176_s9, 0  ;;  %p190_p2 = scmp.eq.s32.totalorder %s785_s28, 1 }
   0x7   : > { %p195_p3 = scmp.ne.s32.totalorder %s711_s25, %s707_s24  ;;  %p196_p4 = scmp.eq.s32.totalorder %s583_s29, 1 }
   0x8   : > { %s800_s10 = scalar_select %p177_p1, %s715_s26, %s179_s8  }
   0x9   : > { %p802_p5 = por %p190_p2, %p189_p0  ;;  %p806_p6 = por %p196_p4, %p195_p3 }
   0xa   : > { %p586_p7 = scmp.ge.s32.totalorder %s719_s27, 1  ;;  %p239_p8 = scmp.lt.s32.totalorder %s719_s27, 3 }
   0xc   : > { %p240_p9 = pnand %p586_p7, %p239_p8 }
   0xd   : > { %p270_p10 = scmp.lt.s32.totalorder (!%p240_p9), %s785_s28, 1  ;;  %s721_s14 = smov (!%p240_p9), 96  }
   0xe   : > { %243 = sbr.rel (%p240_p9) target bundleno = 1608 (0x648), region = 48  ;;  %s722_s15 = smov (!%p240_p9), 64  }
   0xf   : > { %s595_s29 = sshll.u32 (!%p240_p9), %s785_s28, 3 }
  0x13   : > { %v278_v0 = vld [vmem:[%s961_s1 + $0x18] sm:$0xff]  ;;  %v277_v1 = vld [vmem:[%s961_s1 + $0x10] sm:$0xff]  ;;  %v276_v2 = vld [vmem:[%s961_s1 + $0x8] sm:$0xff]  ;;  %s271_s19 = scalar_select %p270_p10, %s785_s28, 1  ;;  %vm283_vm0 = vcmask 261120   ;;  %vm334_vm1 = vcmask 64512  }
  0x14   : > { %299 = vmatpush.msra.mxu0 %v278_v0  ;;  %v275_v3 = vld [vmem:[%s961_s1] sm:$0xff]  ;;  %v723_v23 = vmov 32.0   ;;  %v411_v35 = vld [vmem:[%s962_s2 + $0x18] sm:$0xff]  ;;  %v410_v36 = vld [vmem:[%s962_s2 + $0x10] sm:$0xff] }
  0x15   : > { %s588_s22 = sshll.u32 %s271_s19, 3  ;;  %v640_v5 = vld [vmem:[%s964_s4] ss:$0 sm:$0xff]  ;;  %431 = vmatpush.msra.mxu3 %v411_v35  ;;  %v409_v37 = vld [vmem:[%s962_s2 + $0x8] sm:$0xff]  ;;  %v455_v39 = vld [vmem:[%s963_s3 + $0x78] sm:$0xff] }
  0x16   : > { %300 = vmatpush.msra.mxu0 %v277_v1  ;;  %s273_s8 = scalar_lea.vmem %s960_s0, %s588_s22  ;;  %v408_v38 = vld [vmem:[%s962_s2] sm:$0xff]  ;;  %v454_v40 = vld [vmem:[%s963_s3 + $0x70] sm:$0xff]  ;;  %458 = vmatpush.msra.mxu2 %v455_v39  ;;  %v453_v41 = vld [vmem:[%s963_s3 + $0x68] sm:$0xff]  ;;  %s267_s22 = sand.u32 1, %s711_s25  }
  0x17   : > { %v274_v4 = vld [vmem:[%s273_s8] sm:$0xff]  ;;  %432 = vmatpush.msra.mxu3 %v410_v36  ;;  %v451_v46 = vld [vmem:[%s963_s3 + $0x58] sm:$0xff]  ;;  %v450_v47 = vld [vmem:[%s963_s3 + $0x50] sm:$0xff]  ;;  %s587_s23 = sshll.u32 %s267_s22, 3  ;;  %s509_s20 = scalar_lea.sflag [#allocation3], %s267_s22 }
  0x18   : > { %301 = vmatpush.msra.mxu0 %v276_v2  ;;  %459 = vmatpush.msra.mxu2 %v454_v40  ;;  %v452_v44 = vld [vmem:[%s963_s3 + $0x60] sm:$0xff]  ;;  %v449_v48 = vld [vmem:[%s963_s3 + $0x48] sm:$0xff]  ;;  %v447_v51 = vld [vmem:[%s963_s3 + $0x38] sm:$0xff]  ;;  %s269_s18 = scalar_lea.vmem [#allocation2], %s587_s23  ;;  %s677_s23 = scalar_lea.hbm %s967_s7, 16 }
  0x19   : > { %433 = vmatpush.msra.mxu3 %v409_v37  ;;  %v448_v49 = vld [vmem:[%s963_s3 + $0x40] sm:$0xff]  ;;  %v446_v53 = vld [vmem:[%s963_s3 + $0x30] sm:$0xff]  ;;  %v445_v55 = vld [vmem:[%s963_s3 + $0x28] sm:$0xff]  ;;  %s521_s28 = sshll.u32 %s269_s18, 4  ;;  %s522_s28 = int_to_ptr.vmem [resolvable:$true] %s521_s28 }
  0x1a   : > { %302 = vmatpush.msra.mxu0 %v275_v3  ;;  %460 = vmatpush.msra.mxu2 %v453_v41  ;;  %v444_v57 = vld [vmem:[%s963_s3 + $0x20] sm:$0xff]  ;;  %v443_v59 = vld [vmem:[%s963_s3 + $0x18] sm:$0xff]  ;;  %v442_v3 = vld [vmem:[%s963_s3 + $0x10] sm:$0xff] }
  0x1b   : > { %589 = vmatmul.msk.f32.vlgmr.msra.gmra.mxu0 %vm283_vm0, %v274_v4  ;;  %434 = vmatpush.msra.mxu3 %v408_v38  ;;  %v641_v61 = vld [vmem:[%s966_s6 + $0x1] ss:$0 sm:$0xff]  ;;  %v642_v0 = vld [vmem:[%s966_s6 + $0x2] ss:$0 sm:$0xff] }
  0x1c   : > { %461 = vmatpush.msra.mxu2 %v452_v44 }
  0x1e   : > { %462 = vmatpush.msra.mxu2 %v451_v46 }
  0x20   : > { %463 = vmatpush.msra.mxu2 %v450_v47 }
  0x22   : > { %464 = vmatpush.msra.mxu2 %v449_v48 }
  0x24   : > { %465 = vmatpush.msra.mxu2 %v448_v49 }
  0x26   : > { %466 = vmatpush.msra.mxu2 %v447_v51 }
  0x28   : > { %467 = vmatpush.msra.mxu2 %v446_v53 }
  0x2a   : > { %468 = vmatpush.msra.mxu2 %v445_v55 }
  0x2c   : > { %469 = vmatpush.msra.mxu2 %v444_v57 }
  0x2e   : > { %470 = vmatpush.msra.mxu2 %v443_v59 }
  0x30   : > { %471 = vmatpush.msra.mxu2 %v442_v3 }
  0x98   : > { %v304_v6 = vpop.f32.mrf.mxu0 }
  0x99   : > { %v305_v7 = vadd.f32 %v640_v5, %v304_v6  ;;  %v440_v5 = vld [vmem:[%s963_s3] sm:$0xff] }
  0x9a   : > { %v643_v6 = vld [vmem:[%s965_s5] ss:$0 sm:$0xff] }
  0x9b   : > { %308 = vrot.lane.b32.xlu0 %v305_v7, %s721_s14 }
 0x10d   : > { %v309_v8 = vpop.permute.xlu0 %308 }
 0x10e   : > { %590 = vmatpush.xpose.msk.msra.mxu1 %vm283_vm0, %v309_v8 }
 0x111   : > { %591 = vmatmul.msk.f32.vlgmr.msra.gmra.mxu1 %vm283_vm0, %v305_v7 }
 0x18e   : > { %v331_v9 = vpop.f32.mrf.mxu1 }
 0x18f   : > { %v335_v10 = vsel %vm334_vm1, %v331_v9, -inf }
 0x190   : > { %336 = vmax.xlane.f32.xlu0 %v335_v10  ;;  %v644_v10 = vld [vmem:[%s966_s6] ss:$0 sm:$0xff] }
 0x203   : > { %v337_v11 = vpop.xlane.xlu0 %336 }
 0x204   : > { %v338_v12 = vsub.f32 %v331_v9, %v337_v11 }
 0x206   : > { %v339_v13 = vmul.f32 1.442695, %v338_v12 }
 0x208   : > { %647 = vpow2.f32 %v339_v13 }
 0x20e   : > { %v648_v14 = vpop.eup %647 }
 0x20f   : > { %v341_v15 = vsel %vm334_vm1, %v648_v14, 0.0 }
 0x210   : > { %342 = vadd.xlane.f32.xlu1 %v341_v15 }
 0x229   : > { %346 = vrot.lane.b32.xlu1 %v305_v7, %s722_s15  ;;  %s519_s15 = scalar_lea.hbm %s967_s7, %s595_s29 }
 0x22a   : > { %s523_s19 = sshll.u32 %s519_s15, 4  ;;  %s524_s19 = int_to_ptr.hbm [resolvable:$true] %s523_s19 }
 0x22b   : > { %s671_s21 = sshra.s32 %s524_s19, 4  ;;  %s672_s21 = int_to_ptr.hbm [resolvable:$true] %s671_s21 }
 0x22c   : > { %s673_s29 = scalar_lea.hbm %s672_s21, 8  ;;  %p678_p0 = scmp.lt.s32.totalorder %s672_s21, %s967_s7 }
 0x22d   : > { %p674_p11 = scmp.ne.s32.totalorder %s672_s21, %s673_s29  ;;  %p679_p1 = scmp.lt.s32.totalorder %s677_s23, %s673_s29 }
 0x22f   : > { %p675_p12 = pnand %p674_p11, %p802_p5  ;;  %p680_p2 = por %p679_p1, %p678_p0 }
 0x231   : > { %p676_p13 = pneg %p675_p12 }
 0x233   : > { %p681_p3 = pnand %p680_p2, %p676_p13 }
 0x283   : > { %v343_v16 = vpop.xlane.xlu1 %342 }
 0x284   : > { %649 = vrcp.f32 %v343_v16 }
 0x285   : > { %651 = vrcp.f32 %v723_v23 }
 0x28a   : > { %v650_v17 = vpop.eup %649 }
 0x28b   : > { %v345_v19 = vmul.f32 %v650_v17, %v648_v14  ;;  %v652_v24 = vpop.eup %651 }
 0x28c   : > { %v377_v25 = vmul.f32 32.0, %v652_v24  ;;  %vm381_vm2 = vweird.f32 %v652_v24 }
 0x28e   : > { %v378_v26 = vsub.f32 1.0, %v377_v25 }
 0x290   : > { %v379_v27 = vmul.f32 %v652_v24, %v378_v26 }
 0x292   : > { %v380_v28 = vadd.f32 %v652_v24, %v379_v27 }
 0x294   : > { %v839_v29 = vsel %vm381_vm2, %v652_v24, %v380_v28 }
 0x29b   : > { %v347_v18 = vpop.permute.xlu1 %346 }
 0x29c   : > { %367 = vmatpush.msrb.mxu1 %v347_v18 }
 0x29d   : > { %592 = vmatmul.msk.f32.vlgmr.msrb.gmra.mxu1 %vm334_vm1, %v345_v19 }
 0x31a   : > { %v369_v20 = vpop.f32.mrf.mxu1 }
 0x31b   : > { %v372_v21 = vadd.f32 %v369_v20, %v274_v4  ;;  %v441_v4 = vld [vmem:[%s963_s3 + $0x8] sm:$0xff] }
 0x31c   : > { %472 = vmatpush.msra.mxu2 %v441_v4 }
 0x31d   : > { %v373_v22 = vsel %vm283_vm0, %v372_v21, 0.0 }
 0x31e   : > { %374 = vadd.xlane.f32.xlu2 %v373_v22  ;;  %473 = vmatpush.msra.mxu2 %v440_v5 }
 0x391   : > { %v375_v30 = vpop.xlane.xlu2 %374 }
 0x392   : > { %v383_v31 = vmul.f32 %v839_v29, %v375_v30  ;;  %v645_v30 = vld [vmem:[%s966_s6 + $0x3] ss:$0 sm:$0xff] }
 0x394   : > { %v384_v32 = vsub.f32 %v372_v21, %v383_v31 }
 0x396   : > { %v385_v33 = vmul.f32 %v384_v32, %v384_v32 }
 0x398   : > { %v386_v34 = vsel %vm283_vm0, %v385_v33, 0.0 }
 0x399   : > { %387 = vadd.xlane.f32.xlu2 %v386_v34 }
 0x40c   : > { %v388_v42 = vpop.xlane.xlu2 %387 }
 0x40d   : > { %v389_v43 = vmul.f32 %v388_v42, %v839_v29 }
 0x40f   : > { %v392_v45 = vadd.f32 1e-05, %v389_v43 }
 0x411   : > { %653 = vrsqrt.f32 %v392_v45  ;;  %vm399_vm4 = vweird.f32 %v392_v45 }
 0x417   : > { %v654_v50 = vpop.eup %653 }
 0x418   : > { %v394_v52 = vmul.f32 %v654_v50, %v392_v45  ;;  %vm400_vm3 = vweird.f32 %v654_v50 }
 0x419   : > { %vm401_vm5 = vmor %vm399_vm4, %vm400_vm3 }
 0x41a   : > { %v395_v54 = vmul.f32 %v654_v50, %v394_v52 }
 0x41c   : > { %v396_v56 = vmul.f32 0.5, %v395_v54 }
 0x41e   : > { %v397_v58 = vsub.f32 1.5, %v396_v56 }
 0x420   : > { %v398_v60 = vmul.f32 %v654_v50, %v397_v58 }
 0x422   : > { %v402_v62 = vsel %vm401_vm5, %v654_v50, %v398_v60 }
 0x423   : > { %v403_v63 = vmul.f32 %v402_v62, %v384_v32  ;;  %v646_v32 = vld [vmem:[%s966_s6 + $0x4] ss:$0 sm:$0xff] }
 0x425   : > { %v405_v1 = vmul.f32 %v641_v61, %v403_v63 }
 0x427   : > { %v407_v2 = vadd.f32 %v642_v0, %v405_v1 }
 0x429   : > { %593 = vmatmul.msk.f32.vlgmr.msra.gmra.mxu3 %vm283_vm0, %v407_v2 }
 0x4ac   : > { %v436_v7 = vpop.f32.mrf.mxu3 }
 0x4ad   : > { %v437_v8 = vadd.f32 %v643_v6, %v436_v7 }
 0x4af   : > { %v439_v9 = vmax.f32 %v437_v8, 0.0 }
 0x4b1   : > { %474 = vmatmul.f32.vlgmr.msra.gmra.mxu2 %v439_v9 }
 0x534   : > { %v475_v11 = vpop.f32.mrf.mxu2 }
 0x535   : > { %v476_v12 = vadd.f32 %v644_v10, %v475_v11 }
 0x537   : > { %v478_v13 = vadd.f32 %v476_v12, %v407_v2 }
 0x539   : > { %v479_v14 = vsel %vm283_vm0, %v478_v13, 0.0 }
 0x53a   : > { %480 = vadd.xlane.f32.xlu2 %v479_v14 }
 0x5ad   : > { %v481_v15 = vpop.xlane.xlu2 %480 }
 0x5ae   : > { %v482_v16 = vmul.f32 %v481_v15, %v839_v29 }
 0x5b0   : > { %v483_v17 = vsub.f32 %v478_v13, %v482_v16 }
 0x5b2   : > { %v484_v18 = vmul.f32 %v483_v17, %v483_v17 }
 0x5b4   : > { %v485_v19 = vsel %vm283_vm0, %v484_v18, 0.0 }
 0x5b5   : > { %486 = vadd.xlane.f32.xlu2 %v485_v19 }
 0x628   : > { %v487_v20 = vpop.xlane.xlu2 %486 }
 0x629   : > { %v488_v21 = vmul.f32 %v487_v20, %v839_v29 }
 0x62b   : > { %v491_v22 = vadd.f32 1e-05, %v488_v21 }
 0x62d   : > { %655 = vrsqrt.f32 %v491_v22  ;;  %vm498_vm7 = vweird.f32 %v491_v22 }
 0x633   : > { %v656_v23 = vpop.eup %655 }
 0x634   : > { %v493_v24 = vmul.f32 %v656_v23, %v491_v22  ;;  %vm499_vm6 = vweird.f32 %v656_v23 }
 0x635   : > { %vm500_vm8 = vmor %vm498_vm7, %vm499_vm6 }
 0x636   : > { %v494_v25 = vmul.f32 %v656_v23, %v493_v24 }
 0x638   : > { %v495_v26 = vmul.f32 0.5, %v494_v25 }
 0x63a   : > { %v496_v27 = vsub.f32 1.5, %v495_v26 }
 0x63c   : > { %v497_v28 = vmul.f32 %v656_v23, %v496_v27 }
 0x63e   : > { %v501_v29 = vsel %vm500_vm8, %v656_v23, %v497_v28 }
 0x63f   : > { %v502_v31 = vmul.f32 %v501_v29, %v483_v17 }
 0x641   : > { %v504_v33 = vmul.f32 %v645_v30, %v502_v31 }
 0x643   : > { %v506_v34 = vadd.f32 %v646_v32, %v504_v33 }
 0x645   : > { %507 = vst.msk [vmem:[%s269_s18] sm:$0xff] %vm283_vm0, %v506_v34 }
 0x646   : > { %684 = shalt.err (!%p681_p3)
}
 0x647   : > { %598 = dma.vmem_to_hbm [thread:$0]  (%p802_p5), %s522_s28, 128, %s524_s19, %s509_s20  }
 0x648 PF: > { %p604_p4 = scmp.ge.s32.totalorder %s719_s27, 2  ;;  %s535_s22 = sand.u32 1, %s707_s24  }
 0x649   : > { %s536_s15 = scalar_lea.sflag [#allocation3], %s535_s22 }
 0x64a   : > { %p601_p7 = pnand %p604_p4, %p806_p6 }
 0x64c   : > { %p602_p8 = pneg %p601_p7 }
 0x64e   : > { %702 = dma.done.wait (%p602_p8), %s536_s15, 128  }
 0x64f   : > { %704 = vsyncadd (%p602_p8), %s536_s15, 4294967168  ;;  %p17_p9 = scmp.ge.s32.totalorder %s789_s30, 4   ;;  %s970_s24 = smov %s711_s25 }
 0x650   : > { %s971_s25 = smov %s715_s26  ;;  %s972_s26 = smov %s800_s10 }
 0x651   : > { %s973_s27 = smov %s789_s30  ;;  %19 = sbr.rel (!%p17_p9) target bundleno = 3 (0x3), region = 83 }
 0x656   :  { %542 = vsyncpa [#allocation3], 1 }
 0x657   :  { %544 = vsyncpa [#allocation3 + $0x1], 1 }

</bundles_post_ra>
